<compile_context>
chip_gen: v7x
topology: tpu7x:2x2x1
jax: 0.10.0
libtpu: 0.0.40
codegen_flags: <defaults>
</compile_context>

<pallas_src>
import jax
import jax.numpy as jnp
from jax.experimental import pallas as pl
from jax.experimental.pallas import tpu as pltpu


def _make_drrnn_kernel(depth: int):
    """Builds a kernel with a static number of residual blocks (`depth`)."""

    def kernel(*refs):
        x_ref = refs[0]            # (3, TN)      transposed coordinates
        param_refs = refs[1:-1]    # weights (out, in), biases (out, 1)
        o_ref = refs[-1]           # (out_N, TN)  lane-dense output slab

        x_t = x_ref[...]
        dx = x_t[0:1, :]           # (1, TN)
        dy = x_t[1:2, :]
        dz = x_t[2:3, :]

        # First linear, K == 3: three broadcast multiply-adds on the VPU.
        # h[j, n] = sum_k w0[j, k] * x[k, n] + b0[j]
        w0 = param_refs[0][...]    # (m, 3)
        b0 = param_refs[1][...]    # (m, 1)
        h = (w0[:, 0:1] * dx + w0[:, 1:2] * dy + w0[:, 2:3] * dz) + b0  # (m, TN)

        idx = 2
        for _ in range(depth):
            w1 = param_refs[idx + 0][...]   # (m, m)
            b1 = param_refs[idx + 1][...]   # (m, 1)
            w2 = param_refs[idx + 2][...]   # (m, m)
            b2 = param_refs[idx + 3][...]   # (m, 1)
            idx += 4
            # Block: tanh(L2(tanh(L1(h)))) + h   (transposed space)
            t = jnp.tanh(jnp.dot(w1, h, preferred_element_type=jnp.float32) + b1)
            t = jnp.tanh(jnp.dot(w2, t, preferred_element_type=jnp.float32) + b2)
            h = t + h

        # Last linear: (out_N, m) @ (m, TN) + (out_N, 1)
        wo = param_refs[idx + 0][...]
        bo = param_refs[idx + 1][...]
        out = jnp.dot(wo, h, preferred_element_type=jnp.float32) + bo  # (out_N, TN)

        # Boundary factor x*y*z*(1-x)*(1-y)*(1-z), lane-dense.
        factor = dx * dy * dz * (1.0 - dx) * (1.0 - dy) * (1.0 - dz)   # (1, TN)
        o_ref[...] = (out * factor).astype(o_ref.dtype)

    return kernel


def drrnn_pallas(x, params, depth, out_N, *, tile_n=512):
    """x: (N, 3) float32; params: flat list of (in,out) weights / (1,out) biases."""
    N, in_N = x.shape
    assert in_N == 3, "drrnn forward chunks the input into 3 coordinates"
    m = params[0].shape[1]

    # --- tile sizing -------------------------------------------------------
    tile_n = max(128, (int(tile_n) // 128) * 128)
    # Don't over-pad tiny batches.
    tile_n = min(tile_n, 128 * pl.cdiv(N, 128))
    # Keep >= 2 grid steps when the batch allows it (v7x has 2 TensorCores).
    if N > 128:
        tile_n = min(tile_n, 128 * pl.cdiv(N, 2 * 128))

    n_pad = tile_n * pl.cdiv(N, tile_n)
    grid_n = n_pad // tile_n

    # --- wrapper-side layout changes (no in-kernel transposes) -------------
    x32 = jnp.asarray(x, jnp.float32)
    if n_pad != N:
        x32 = jnp.pad(x32, ((0, n_pad - N), (0, 0)))   # zero pad -> factor == 0
    x_t = x32.T                                         # (3, n_pad)
    params_t = [jnp.asarray(p, jnp.float32).T for p in params]  # (out,in)/(out,1)

    kernel = _make_drrnn_kernel(depth)

    # Parameters are small (<100 KB) -> full, untiled blocks resident in VMEM.
    param_specs = [pl.BlockSpec(p.shape, lambda i: (0, 0)) for p in params_t]

    grid_spec = pltpu.PrefetchScalarGridSpec(
        num_scalar_prefetch=0,
        grid=(grid_n,),
        in_specs=[pl.BlockSpec((in_N, tile_n), lambda i: (0, i))] + param_specs,
        out_specs=pl.BlockSpec((out_N, tile_n), lambda i: (0, i)),
        scratch_shapes=[],
    )

    # Advisory cost estimate for XLA's scheduler.
    flops_per_pt = 2 * in_N * m + depth * 2 * (2 * m * m) + 2 * m * out_N + 16
    param_bytes = sum(int(p.size) * 4 for p in params_t)
    cost = pl.CostEstimate(
        flops=int(n_pad * flops_per_pt),
        transcendentals=int(n_pad * 2 * depth * m),
        bytes_accessed=int(n_pad * (in_N + out_N) * 4 + param_bytes),
    )

    out_t = pl.pallas_call(
        kernel,
        out_shape=jax.ShapeDtypeStruct((out_N, n_pad), jnp.float32),
        grid_spec=grid_spec,
        compiler_params=pltpu.CompilerParams(
            dimension_semantics=("parallel",),
        ),
        cost_estimate=cost,
    )(x_t, *params_t)

    # Back to the PyTorch-style (N, out_N) layout; drop batch padding.
    return out_t[:, :N].T


# ----------------------------------------------------------------------------
# Deterministic parameter construction (PyTorch nn.Linear default init style).
# Weights stored as (in, out) == W_pt.T, biases as (1, out).
# ----------------------------------------------------------------------------
def _linear_params(key, fan_in, fan_out):
    kw, kb = jax.random.split(key)
    bound = 1.0 / jnp.sqrt(jnp.float32(fan_in))
    w = jax.random.uniform(kw, (fan_in, fan_out), jnp.float32, -bound, bound)
    b = jax.random.uniform(kb, (1, fan_out), jnp.float32, -bound, bound)
    return w, b


def build_params(key, in_N, m, depth, out_N):
    params = []
    keys = jax.random.split(key, 2 + 2 * depth)
    k_idx = 0
    w, b = _linear_params(keys[k_idx], in_N, m); k_idx += 1
    params += [w, b]
    for _ in range(depth):
        w1, b1 = _linear_params(keys[k_idx], m, m); k_idx += 1
        w2, b2 = _linear_params(keys[k_idx], m, m); k_idx += 1
        params += [w1, b1, w2, b2]
    w, b = _linear_params(keys[k_idx], m, out_N); k_idx += 1
    params += [w, b]
    return params


def drrnn_reference(x, params, depth):
    """Pure-JAX reference mirroring the PyTorch forward."""
    dx, dy, dz = x[:, 0:1], x[:, 1:2], x[:, 2:3]
    h = x @ params[0] + params[1]
    idx = 2
    for _ in range(depth):
        w1, b1, w2, b2 = params[idx], params[idx + 1], params[idx + 2], params[idx + 3]
        idx += 4
        h = jnp.tanh(jnp.tanh(h @ w1 + b1) @ w2 + b2) + h
    out = h @ params[idx] + params[idx + 1]
    return out * dx * dy * dz * (1.0 - dx) * (1.0 - dy) * (1.0 - dz)


if __name__ == "__main__":
    in_N, m, depth, out_N = 3, 32, 2, 1
    N = 1024  # batch of 3-D collocation points -> grid of 2 tiles of 512

    key = jax.random.PRNGKey(0)
    k_params, k_x = jax.random.split(key)
    params = build_params(k_params, in_N, m, depth, out_N)
    x = jax.random.uniform(k_x, (N, in_N), jnp.float32)  # points in [0,1]^3

    out = drrnn_pallas(x, params, depth, out_N, tile_n=512)
    out = jax.block_until_ready(out)

    ref = drrnn_reference(x, params, depth)
    assert out.shape == (N, out_N)
    assert jnp.allclose(out, ref, atol=2e-5, rtol=1e-4), "mismatch vs reference"

    # Also exercise a ragged batch (padding path) once for robustness.
    x_rag = x[: N - 37]
    out_rag = jax.block_until_ready(drrnn_pallas(x_rag, params, depth, out_N))
    ref_rag = drrnn_reference(x_rag, params, depth)
    assert out_rag.shape == (N - 37, out_N)
    assert jnp.allclose(out_rag, ref_rag, atol=2e-5, rtol=1e-4), "ragged mismatch"

    print("KERNEL_OK")
</pallas_src>

<mosaic_0001>
module attributes {stable_mosaic.version = 11 : i64} {
  func.func @kernel(%arg0: i32, %arg1: memref<3x512xf32, #tpu.memory_space<vmem>>, %arg2: memref<32x3xf32, #tpu.memory_space<vmem>>, %arg3: memref<32x1xf32, #tpu.memory_space<vmem>>, %arg4: memref<32x32xf32, #tpu.memory_space<vmem>>, %arg5: memref<32x1xf32, #tpu.memory_space<vmem>>, %arg6: memref<32x32xf32, #tpu.memory_space<vmem>>, %arg7: memref<32x1xf32, #tpu.memory_space<vmem>>, %arg8: memref<32x32xf32, #tpu.memory_space<vmem>>, %arg9: memref<32x1xf32, #tpu.memory_space<vmem>>, %arg10: memref<32x32xf32, #tpu.memory_space<vmem>>, %arg11: memref<32x1xf32, #tpu.memory_space<vmem>>, %arg12: memref<1x32xf32, #tpu.memory_space<vmem>>, %arg13: memref<1x1xf32, #tpu.memory_space<vmem>>, %arg14: memref<1x512xf32, #tpu.memory_space<vmem>>) attributes {dimension_semantics = [#tpu.dimension_semantics<parallel>], iteration_bounds = array<i64: 2>, scalar_prefetch = 0 : i64, scratch_operands = 0 : i64, tpu.core_type = #tpu.core_type<tc>, window_params = [{transform_indices = @transform_0, window_bounds = array<i64: 3, 512>}, {pipeline_mode = #tpu.pipeline_mode<synchronous>, transform_indices = @transform_1, window_bounds = array<i64: 32, 3>}, {pipeline_mode = #tpu.pipeline_mode<synchronous>, transform_indices = @transform_2, window_bounds = array<i64: 32, 1>}, {pipeline_mode = #tpu.pipeline_mode<synchronous>, transform_indices = @transform_3, window_bounds = array<i64: 32, 32>}, {pipeline_mode = #tpu.pipeline_mode<synchronous>, transform_indices = @transform_4, window_bounds = array<i64: 32, 1>}, {pipeline_mode = #tpu.pipeline_mode<synchronous>, transform_indices = @transform_5, window_bounds = array<i64: 32, 32>}, {pipeline_mode = #tpu.pipeline_mode<synchronous>, transform_indices = @transform_6, window_bounds = array<i64: 32, 1>}, {pipeline_mode = #tpu.pipeline_mode<synchronous>, transform_indices = @transform_7, window_bounds = array<i64: 32, 32>}, {pipeline_mode = #tpu.pipeline_mode<synchronous>, transform_indices = @transform_8, window_bounds = array<i64: 32, 1>}, {pipeline_mode = #tpu.pipeline_mode<synchronous>, transform_indices = @transform_9, window_bounds = array<i64: 32, 32>}, {pipeline_mode = #tpu.pipeline_mode<synchronous>, transform_indices = @transform_10, window_bounds = array<i64: 32, 1>}, {pipeline_mode = #tpu.pipeline_mode<synchronous>, transform_indices = @transform_11, window_bounds = array<i64: 1, 32>}, {pipeline_mode = #tpu.pipeline_mode<synchronous>, transform_indices = @transform_12, window_bounds = array<i64: 1, 1>}, {transform_indices = @transform_13, window_bounds = array<i64: 1, 512>}]} {
    %c0 = arith.constant 0 : index
    %c0_0 = arith.constant 0 : index
    %0 = vector.load %arg1[%c0, %c0_0] : memref<3x512xf32, #tpu.memory_space<vmem>>, vector<3x512xf32>
    %1 = vector.extract_strided_slice %0 {offsets = [0, 0], sizes = [1, 512], strides = [1, 1]} : vector<3x512xf32> to vector<1x512xf32>
    %2 = vector.extract_strided_slice %0 {offsets = [1, 0], sizes = [1, 512], strides = [1, 1]} : vector<3x512xf32> to vector<1x512xf32>
    %3 = vector.extract_strided_slice %0 {offsets = [2, 0], sizes = [1, 512], strides = [1, 1]} : vector<3x512xf32> to vector<1x512xf32>
    %c0_1 = arith.constant 0 : index
    %c0_2 = arith.constant 0 : index
    %4 = vector.load %arg2[%c0_1, %c0_2] : memref<32x3xf32, #tpu.memory_space<vmem>>, vector<32x3xf32>
    %c0_3 = arith.constant 0 : index
    %c0_4 = arith.constant 0 : index
    %5 = vector.load %arg3[%c0_3, %c0_4] : memref<32x1xf32, #tpu.memory_space<vmem>>, vector<32x1xf32>
    %6 = vector.extract_strided_slice %4 {offsets = [0, 0], sizes = [32, 1], strides = [1, 1]} : vector<32x3xf32> to vector<32x1xf32>
    %7 = vector.broadcast %6 : vector<32x1xf32> to vector<32x512xf32>
    %8 = vector.broadcast %1 : vector<1x512xf32> to vector<32x512xf32>
    %9 = arith.mulf %7, %8 : vector<32x512xf32>
    %10 = vector.extract_strided_slice %4 {offsets = [0, 1], sizes = [32, 1], strides = [1, 1]} : vector<32x3xf32> to vector<32x1xf32>
    %11 = vector.broadcast %10 : vector<32x1xf32> to vector<32x512xf32>
    %12 = vector.broadcast %2 : vector<1x512xf32> to vector<32x512xf32>
    %13 = arith.mulf %11, %12 : vector<32x512xf32>
    %14 = arith.addf %9, %13 : vector<32x512xf32>
    %15 = vector.extract_strided_slice %4 {offsets = [0, 2], sizes = [32, 1], strides = [1, 1]} : vector<32x3xf32> to vector<32x1xf32>
    %16 = vector.broadcast %15 : vector<32x1xf32> to vector<32x512xf32>
    %17 = vector.broadcast %3 : vector<1x512xf32> to vector<32x512xf32>
    %18 = arith.mulf %16, %17 : vector<32x512xf32>
    %19 = arith.addf %14, %18 : vector<32x512xf32>
    %20 = vector.broadcast %5 : vector<32x1xf32> to vector<32x512xf32>
    %21 = arith.addf %19, %20 : vector<32x512xf32>
    %c0_5 = arith.constant 0 : index
    %c0_6 = arith.constant 0 : index
    %22 = vector.load %arg4[%c0_5, %c0_6] : memref<32x32xf32, #tpu.memory_space<vmem>>, vector<32x32xf32>
    %c0_7 = arith.constant 0 : index
    %c0_8 = arith.constant 0 : index
    %23 = vector.load %arg5[%c0_7, %c0_8] : memref<32x1xf32, #tpu.memory_space<vmem>>, vector<32x1xf32>
    %c0_9 = arith.constant 0 : index
    %c0_10 = arith.constant 0 : index
    %24 = vector.load %arg6[%c0_9, %c0_10] : memref<32x32xf32, #tpu.memory_space<vmem>>, vector<32x32xf32>
    %c0_11 = arith.constant 0 : index
    %c0_12 = arith.constant 0 : index
    %25 = vector.load %arg7[%c0_11, %c0_12] : memref<32x1xf32, #tpu.memory_space<vmem>>, vector<32x1xf32>
    %cst = arith.constant dense<0.000000e+00> : vector<32x512xf32>
    %26 = tpu.matmul %22, %21, %cst {dimension_numbers = #tpu.dot_dimension_numbers<[1], [0], [0], [1], [0, 0, 1, 1], [], []>} : vector<32x32xf32>, vector<32x512xf32>, vector<32x512xf32> -> vector<32x512xf32>
    %27 = vector.broadcast %23 : vector<32x1xf32> to vector<32x512xf32>
    %28 = arith.addf %26, %27 : vector<32x512xf32>
    %29 = math.tanh %28 : vector<32x512xf32>
    %cst_13 = arith.constant dense<0.000000e+00> : vector<32x512xf32>
    %30 = tpu.matmul %24, %29, %cst_13 {dimension_numbers = #tpu.dot_dimension_numbers<[1], [0], [0], [1], [0, 0, 1, 1], [], []>} : vector<32x32xf32>, vector<32x512xf32>, vector<32x512xf32> -> vector<32x512xf32>
    %31 = vector.broadcast %25 : vector<32x1xf32> to vector<32x512xf32>
    %32 = arith.addf %30, %31 : vector<32x512xf32>
    %33 = math.tanh %32 : vector<32x512xf32>
    %34 = arith.addf %33, %21 : vector<32x512xf32>
    %c0_14 = arith.constant 0 : index
    %c0_15 = arith.constant 0 : index
    %35 = vector.load %arg8[%c0_14, %c0_15] : memref<32x32xf32, #tpu.memory_space<vmem>>, vector<32x32xf32>
    %c0_16 = arith.constant 0 : index
    %c0_17 = arith.constant 0 : index
    %36 = vector.load %arg9[%c0_16, %c0_17] : memref<32x1xf32, #tpu.memory_space<vmem>>, vector<32x1xf32>
    %c0_18 = arith.constant 0 : index
    %c0_19 = arith.constant 0 : index
    %37 = vector.load %arg10[%c0_18, %c0_19] : memref<32x32xf32, #tpu.memory_space<vmem>>, vector<32x32xf32>
    %c0_20 = arith.constant 0 : index
    %c0_21 = arith.constant 0 : index
    %38 = vector.load %arg11[%c0_20, %c0_21] : memref<32x1xf32, #tpu.memory_space<vmem>>, vector<32x1xf32>
    %cst_22 = arith.constant dense<0.000000e+00> : vector<32x512xf32>
    %39 = tpu.matmul %35, %34, %cst_22 {dimension_numbers = #tpu.dot_dimension_numbers<[1], [0], [0], [1], [0, 0, 1, 1], [], []>} : vector<32x32xf32>, vector<32x512xf32>, vector<32x512xf32> -> vector<32x512xf32>
    %40 = vector.broadcast %36 : vector<32x1xf32> to vector<32x512xf32>
    %41 = arith.addf %39, %40 : vector<32x512xf32>
    %42 = math.tanh %41 : vector<32x512xf32>
    %cst_23 = arith.constant dense<0.000000e+00> : vector<32x512xf32>
    %43 = tpu.matmul %37, %42, %cst_23 {dimension_numbers = #tpu.dot_dimension_numbers<[1], [0], [0], [1], [0, 0, 1, 1], [], []>} : vector<32x32xf32>, vector<32x512xf32>, vector<32x512xf32> -> vector<32x512xf32>
    %44 = vector.broadcast %38 : vector<32x1xf32> to vector<32x512xf32>
    %45 = arith.addf %43, %44 : vector<32x512xf32>
    %46 = math.tanh %45 : vector<32x512xf32>
    %47 = arith.addf %46, %34 : vector<32x512xf32>
    %c0_24 = arith.constant 0 : index
    %c0_25 = arith.constant 0 : index
    %48 = vector.load %arg12[%c0_24, %c0_25] : memref<1x32xf32, #tpu.memory_space<vmem>>, vector<1x32xf32>
    %c0_26 = arith.constant 0 : index
    %c0_27 = arith.constant 0 : index
    %49 = vector.load %arg13[%c0_26, %c0_27] : memref<1x1xf32, #tpu.memory_space<vmem>>, vector<1x1xf32>
    %cst_28 = arith.constant dense<0.000000e+00> : vector<1x512xf32>
    %50 = tpu.matmul %48, %47, %cst_28 {dimension_numbers = #tpu.dot_dimension_numbers<[1], [0], [0], [1], [0, 0, 1, 1], [], []>} : vector<1x32xf32>, vector<32x512xf32>, vector<1x512xf32> -> vector<1x512xf32>
    %51 = vector.broadcast %49 : vector<1x1xf32> to vector<1x512xf32>
    %52 = arith.addf %50, %51 : vector<1x512xf32>
    %53 = arith.mulf %1, %2 : vector<1x512xf32>
    %54 = arith.mulf %53, %3 : vector<1x512xf32>
    %cst_29 = arith.constant 1.000000e+00 : f32
    %55 = vector.broadcast %cst_29 : f32 to vector<1x512xf32>
    %56 = arith.subf %55, %1 : vector<1x512xf32>
    %57 = arith.mulf %54, %56 : vector<1x512xf32>
    %cst_30 = arith.constant 1.000000e+00 : f32
    %58 = vector.broadcast %cst_30 : f32 to vector<1x512xf32>
    %59 = arith.subf %58, %2 : vector<1x512xf32>
    %60 = arith.mulf %57, %59 : vector<1x512xf32>
    %cst_31 = arith.constant 1.000000e+00 : f32
    %61 = vector.broadcast %cst_31 : f32 to vector<1x512xf32>
    %62 = arith.subf %61, %3 : vector<1x512xf32>
    %63 = arith.mulf %60, %62 : vector<1x512xf32>
    %64 = arith.mulf %52, %63 : vector<1x512xf32>
    %c0_32 = arith.constant 0 : index
    %c0_33 = arith.constant 0 : index
    %65 = vector.load %arg14[%c0_32, %c0_33] : memref<1x512xf32, #tpu.memory_space<vmem>>, vector<1x512xf32>
    tpu.vector_store %arg14[%c0_32, %c0_33], %64 {strides = array<i32>} : memref<1x512xf32, #tpu.memory_space<vmem>>, vector<1x512xf32>,
    return
  }
  func.func @transform_0(%arg0: i32) -> (i32, i32) {
    %c0_i32 = arith.constant 0 : i32
    %c0_i32_0 = arith.constant 0 : i32
    return %c0_i32, %arg0 : i32, i32
  }
  func.func @transform_1(%arg0: i32) -> (i32, i32) {
    %c0_i32 = arith.constant 0 : i32
    %c0_i32_0 = arith.constant 0 : i32
    %c0_i32_1 = arith.constant 0 : i32
    return %c0_i32, %c0_i32_0 : i32, i32
  }
  func.func @transform_2(%arg0: i32) -> (i32, i32) {
    %c0_i32 = arith.constant 0 : i32
    %c0_i32_0 = arith.constant 0 : i32
    %c0_i32_1 = arith.constant 0 : i32
    return %c0_i32, %c0_i32_0 : i32, i32
  }
  func.func @transform_3(%arg0: i32) -> (i32, i32) {
    %c0_i32 = arith.constant 0 : i32
    %c0_i32_0 = arith.constant 0 : i32
    %c0_i32_1 = arith.constant 0 : i32
    return %c0_i32, %c0_i32_0 : i32, i32
  }
  func.func @transform_4(%arg0: i32) -> (i32, i32) {
    %c0_i32 = arith.constant 0 : i32
    %c0_i32_0 = arith.constant 0 : i32
    %c0_i32_1 = arith.constant 0 : i32
    return %c0_i32, %c0_i32_0 : i32, i32
  }
  func.func @transform_5(%arg0: i32) -> (i32, i32) {
    %c0_i32 = arith.constant 0 : i32
    %c0_i32_0 = arith.constant 0 : i32
    %c0_i32_1 = arith.constant 0 : i32
    return %c0_i32, %c0_i32_0 : i32, i32
  }
  func.func @transform_6(%arg0: i32) -> (i32, i32) {
    %c0_i32 = arith.constant 0 : i32
    %c0_i32_0 = arith.constant 0 : i32
    %c0_i32_1 = arith.constant 0 : i32
    return %c0_i32, %c0_i32_0 : i32, i32
  }
  func.func @transform_7(%arg0: i32) -> (i32, i32) {
    %c0_i32 = arith.constant 0 : i32
    %c0_i32_0 = arith.constant 0 : i32
    %c0_i32_1 = arith.constant 0 : i32
    return %c0_i32, %c0_i32_0 : i32, i32
  }
  func.func @transform_8(%arg0: i32) -> (i32, i32) {
    %c0_i32 = arith.constant 0 : i32
    %c0_i32_0 = arith.constant 0 : i32
    %c0_i32_1 = arith.constant 0 : i32
    return %c0_i32, %c0_i32_0 : i32, i32
  }
  func.func @transform_9(%arg0: i32) -> (i32, i32) {
    %c0_i32 = arith.constant 0 : i32
    %c0_i32_0 = arith.constant 0 : i32
    %c0_i32_1 = arith.constant 0 : i32
    return %c0_i32, %c0_i32_0 : i32, i32
  }
  func.func @transform_10(%arg0: i32) -> (i32, i32) {
    %c0_i32 = arith.constant 0 : i32
    %c0_i32_0 = arith.constant 0 : i32
    %c0_i32_1 = arith.constant 0 : i32
    return %c0_i32, %c0_i32_0 : i32, i32
  }
  func.func @transform_11(%arg0: i32) -> (i32, i32) {
    %c0_i32 = arith.constant 0 : i32
    %c0_i32_0 = arith.constant 0 : i32
    %c0_i32_1 = arith.constant 0 : i32
    return %c0_i32, %c0_i32_0 : i32, i32
  }
  func.func @transform_12(%arg0: i32) -> (i32, i32) {
    %c0_i32 = arith.constant 0 : i32
    %c0_i32_0 = arith.constant 0 : i32
    %c0_i32_1 = arith.constant 0 : i32
    return %c0_i32, %c0_i32_0 : i32, i32
  }
  func.func @transform_13(%arg0: i32) -> (i32, i32) {
    %c0_i32 = arith.constant 0 : i32
    %c0_i32_0 = arith.constant 0 : i32
    return %c0_i32, %arg0 : i32, i32
  }
}

</mosaic_0001>

<bundles_post_ra>
// kernel: tpu_custom_call.1
= control target key start
LH: loop header
LB: loop body
LE: loop exit
PB: predicated region body
PF: predicated region fallthrough
CT: control target
= control target key end

     0   :  { %s2998_s0 = inlined_call_operand.vmem [shape: f32[3,1024], index: 0, kind: input, shape index: {}]   ;;  %s2999_s1 = inlined_call_operand.vmem [shape: f32[32,3], index: 1, kind: input, shape index: {}]   ;;  %s3000_s2 = inlined_call_operand.vmem [shape: f32[32,1], index: 2, kind: input, shape index: {}]   ;;  %s3001_s3 = inlined_call_operand.vmem [shape: f32[32,32], index: 3, kind: input, shape index: {}]   ;;  %s3002_s4 = inlined_call_operand.vmem [shape: f32[32,1], index: 4, kind: input, shape index: {}]   ;;  %s3003_s5 = inlined_call_operand.vmem [shape: f32[32,32], index: 5, kind: input, shape index: {}]   ;;  %s3004_s6 = inlined_call_operand.vmem [shape: f32[32,1], index: 6, kind: input, shape index: {}]   ;;  %s3005_s7 = inlined_call_operand.vmem [shape: f32[32,32], index: 7, kind: input, shape index: {}]   ;;  %s3006_s8 = inlined_call_operand.vmem [shape: f32[32,1], index: 8, kind: input, shape index: {}]   ;;  %s3007_s9 = inlined_call_operand.vmem [shape: f32[32,32], index: 9, kind: input, shape index: {}]   ;;  %s3008_s10 = inlined_call_operand.vmem [shape: f32[32,1], index: 10, kind: input, shape index: {}]   ;;  %s3009_s11 = inlined_call_operand.vmem [shape: f32[1,32], index: 11, kind: input, shape index: {}]   ;;  %s3010_s12 = inlined_call_operand.<no memory space> [shape: f32[1,1], index: 12, kind: input, shape index: {}]   ;;  %s3011_s13 = inlined_call_operand.hbm [shape: f32[1,1024], index: 13, kind: output, shape index: {}]  }
   0x1   :  { %3013 = sst [smem:[#allocation6_spill]] %s2998_s0  ;;  %v18_v0 = vstv %s3010_s12 }
   0x2   :  { %3014 = sst [smem:[#allocation7_spill]] %s2999_s1  ;;  %19 = vst [vmem:[#allocation2] sm:$0x1] %v18_v0 }
   0x3   :  { %20 = vsyncpa [#allocation4], 0 }
   0x4   :  { %22 = vsyncpa [#allocation4 + $0x1], 0  ;;  %s2489_s27 = smov 0   ;;  %s2491_s28 = smov 0  }
   0x5   :  { %s2493_s29 = smov 0   ;;  %s2495_s30 = smov 0  }
   0x6 LB: > { %s2510_s12 = sadd.s32 4294967295, %s2408_s30   ;;  %s2029_s14 = sadd.s32 4294967294, %s2408_s30   ;;  %s2408_s30 = sphi %s2495_s30, %s3023_s30   ;;  %s2404_s29 = sphi %s2493_s29, %s3022_s29   ;;  %s2400_s28 = sphi %s2491_s28, %s3021_s28   ;;  %s2396_s27 = sphi %s2489_s27, %s3020_s27  }
   0x7   : > { %s2514_s15 = sadd.s32 1, %s2408_s30   ;;  %s313_s16 = sadd.s32 1, %s2404_s29 }
   0x8   : > { %s310_s17 = ssub.s32 %s2408_s30, %s2514_s15  ;;  %p323_p0 = scmp.ne.s32.totalorder %s2404_s29, %s2400_s28 }
   0x9   : > { %p311_p1 = scmp.eq.s32.totalorder %s310_s17, 0  ;;  %p324_p2 = scmp.eq.s32.totalorder %s2510_s12, 1 }
   0xa   : > { %p329_p3 = scmp.ne.s32.totalorder %s2400_s28, %s2396_s27  ;;  %p330_p4 = scmp.eq.s32.totalorder %s2029_s14, 1 }
   0xb   : > { %s2525_s18 = scalar_select %p311_p1, %s2404_s29, %s313_s16  }
   0xc   : > { %p2527_p5 = por %p324_p2, %p323_p0  ;;  %p2531_p6 = por %p330_p4, %p329_p3 }
   0xd   : > { %p2032_p7 = scmp.ge.s32.totalorder %s2408_s30, 1  ;;  %p393_p8 = scmp.lt.s32.totalorder %s2408_s30, 3 }
   0xf   : > { %p394_p9 = pnand %p2032_p7, %p393_p8 }
  0x10   : > { %s3017_s1 = sld [smem:[#allocation7_spill]] (!%p394_p9)  ;;  %v2410_v2 = vmov (!%p394_p9), 2   ;;  %v2411_v3 = vmov (!%p394_p9), 1   ;;  %v2412_v6 = vmov (!%p394_p9), 0   ;;  %v451_v8 = vld [vmem:[%s3000_s2 + $0x8] sm:$0xff] (!%p394_p9)  ;;  %v736_v9 = vld [vmem:[%s3002_s4] sm:$0xff] (!%p394_p9)  ;;  %v3012_v30 = vlaneseq (!%p394_p9) }
  0x11   : > { %397 = sbr.rel (%p394_p9) target bundleno = 1424 (0x590), region = 72  ;;  %2209 = vset.pattern.permute.xlu0 (!%p394_p9), %v2410_v2  ;;  %2208 = vset.pattern.permute.xlu1 (!%p394_p9), %v2411_v3  ;;  %v738_v10 = vld [vmem:[%s3002_s4 + $0x10] sm:$0xff] (!%p394_p9)  ;;  %v744_v11 = vld [vmem:[%s3004_s6] sm:$0xff] (!%p394_p9)  ;;  %v453_v16 = vld [vmem:[%s3000_s2 + $0x18] sm:$0xff] (!%p394_p9)  ;;  %v2413_v21 = vmov (!%p394_p9), 0.0   ;;  %s2034_s21 = sshll.u32 (!%p394_p9), %s2510_s12, 2 }
  0x12   : > { %v450_v12 = vld [vmem:[%s3000_s2] sm:$0xff] (!%p394_p9)  ;;  %v746_v13 = vld [vmem:[%s3004_s6 + $0x10] sm:$0xff] (!%p394_p9)  ;;  %v737_v18 = vld [vmem:[%s3002_s4 + $0x8] sm:$0xff] (!%p394_p9)  ;;  %845 = vmatprep.mubr.f32.mxu0 (!%p394_p9), %v2413_v21  ;;  %934 = vmatprep.mubr.f32.mxu1 (!%p394_p9), %v2413_v21  ;;  %p438_p10 = scmp.lt.s32.totalorder (!%p394_p9), %s2034_s21, 7  ;;  %v2613_v33 = vshrl.u32 (!%p394_p9), %v3012_v30, 7  ;;  %s3018_s0 = sld [smem:[#allocation6_spill]] (!%p394_p9) }
  0x13   : > { %v452_v14 = vld [vmem:[%s3000_s2 + $0x10] sm:$0xff] (!%p394_p9)  ;;  %v1221_v15 = vld [vmem:[%s3006_s8] sm:$0xff] (!%p394_p9)  ;;  %v739_v20 = vld [vmem:[%s3002_s4 + $0x18] sm:$0xff] (!%p394_p9)  ;;  %vm768_vm0 = vcmask (!%p394_p9), 261120   ;;  %s2083_s24 = sshll.u32 (!%p394_p9), %s2510_s12, 6  ;;  %s2415_s12 = smov (!%p394_p9), [#allocation3]  }
  0x14   : > { %v1223_v17 = vld [vmem:[%s3006_s8 + $0x10] sm:$0xff] (!%p394_p9)  ;;  %v1229_v19 = vld [vmem:[%s3008_s10] sm:$0xff] (!%p394_p9)  ;;  %v745_v23 = vld [vmem:[%s3004_s6 + $0x8] sm:$0xff] (!%p394_p9)  ;;  %v546_v35 = vsub.s32 (!%p394_p9), 1, %v2613_v33  ;;  %v550_v37 = vsub.s32 (!%p394_p9), 5, %v2613_v33  ;;  %v630_v40 = vsub.s32 (!%p394_p9), 2, %v2613_v33  ;;  %s2956_s17 = scalar_lea.hbm (!%p394_p9), %s3011_s13, %s2083_s24 }
  0x15   : > { %v1231_v22 = vld [vmem:[%s3008_s10 + $0x10] sm:$0xff] (!%p394_p9)  ;;  %v1702_v24 = vld [vmem:[#allocation2] sm:$0x1] (!%p394_p9)  ;;  %v747_v25 = vld [vmem:[%s3004_s6 + $0x18] sm:$0xff] (!%p394_p9)  ;;  %v2628_v41 = vsub.s32 (!%p394_p9), 0, %v2613_v33  ;;  %v2631_v42 = vsub.s32 (!%p394_p9), 4, %v2613_v33 }
  0x16   : > { %v446_v1 = vld [vmem:[%s3017_s1] sm:$0xff] (!%p394_p9)  ;;  %v448_v4 = vld [vmem:[%s3017_s1 + $0x10] sm:$0xff] (!%p394_p9)  ;;  %v447_v5 = vld [vmem:[%s3017_s1 + $0x8] sm:$0xff] (!%p394_p9)  ;;  %v634_v44 = vsub.s32 (!%p394_p9), 6, %v2613_v33 }
  0x17   : > { %613 = vperm.xlu0 (!%p394_p9), %2209, %v446_v1   ;;  %529 = vperm.xlu1 (!%p394_p9), %2208, %v446_v1   ;;  %v449_v7 = vld [vmem:[%s3017_s1 + $0x18] sm:$0xff] (!%p394_p9)  ;;  %v1222_v26 = vld [vmem:[%s3006_s8 + $0x8] sm:$0xff] (!%p394_p9) }
  0x18   : > { %v1224_v27 = vld [vmem:[%s3006_s8 + $0x18] sm:$0xff]  ;;  %v1230_v28 = vld [vmem:[%s3008_s10 + $0x8] sm:$0xff]  ;;  %s3025_s21 = smov (!%p438_p10, %s2034_s21), 7 }
  0x19   : > { %v1232_v29 = vld [vmem:[%s3008_s10 + $0x18] sm:$0xff]  ;;  %s2035_s22 = sshll.u32 %s3025_s21, 2 }
  0x1a   : > { %s2618_s25 = scalar_lea.vmem %s3018_s0, %s2035_s22 }
  0x1b   : > { %621 = vperm.xlu0 %2209, %v448_v4   ;;  %533 = vperm.xlu1 %2208, %v447_v5   ;;  %v444_v38 = vld [vmem:[%s2618_s25] sm:$0x77]  ;;  %v445_v39 = vld [vmem:[%s2618_s25 + $0x8] sm:$0x77] }
  0x1c   : > { %v547_v43 = vrot.slane %v444_v38, %v546_v35  ;;  %v551_v46 = vrot.slane %v444_v38, %v550_v37  ;;  %v555_v47 = vrot.slane %v445_v39, %v546_v35  ;;  %v559_v48 = vrot.slane %v445_v39, %v550_v37 }
  0x1d   : > { %v631_v49 = vrot.slane %v444_v38, %v630_v40  ;;  %v479_v51 = vrot.slane %v444_v38, %v2628_v41  ;;  %v483_v52 = vrot.slane %v444_v38, %v2631_v42  ;;  %v487_v53 = vrot.slane %v445_v39, %v2628_v41 }
  0x1e   : > { %v491_v54 = vrot.slane %v445_v39, %v2631_v42  ;;  %v2638_v55 = vrot.slane %v547_v43, %v546_v35  ;;  %v635_v56 = vrot.slane %v444_v38, %v634_v44  ;;  %v639_v57 = vrot.slane %v445_v39, %v630_v40 }
  0x1f   : > { %2213 = vset.pattern.permute.xlu0 %v2412_v6  ;;  %2210 = vset.pattern.permute.xlu1 %v2410_v2  ;;  %v643_v58 = vrot.slane %v445_v39, %v634_v44  ;;  %v2640_v59 = vrot.slane %v551_v46, %v546_v35  ;;  %v2642_v60 = vrot.slane %v555_v47, %v546_v35 }
  0x20   : > { %456 = vperm.xlu0 %2213, %v446_v1   ;;  %617 = vperm.xlu1 %2210, %v447_v5   ;;  %v2644_v61 = vrot.slane %v559_v48, %v546_v35  ;;  %v2646_v63 = vrot.slane %v631_v49, %v630_v40  ;;  %v499_v0 = vrot.slane %v479_v51, %v2628_v41 }
  0x21   : > { %v503_v1 = vrot.slane %v483_v52, %v2628_v41 }
  0x24   : > { %461 = vperm.xlu0 %2213, %v447_v5   ;;  %2211 = vset.pattern.permute.xlu1 %v2412_v6  ;;  %v2653_v5 = vrot.slane %v635_v56, %v630_v40 }
  0x25   : > { %466 = vperm.xlu1 %2211, %v448_v4  }
  0x28   : > { %471 = vperm.xlu0 %2213, %v449_v7  }
  0x29   : > { %2212 = vset.pattern.permute.xlu1 %v2411_v3  ;;  %v511_v3 = vrot.slane %v491_v54, %v2628_v41 }
  0x2a   : > { %537 = vperm.xlu1 %2212, %v448_v4  }
  0x2c   : > { %703 = vperm.xlu0 %2213, %v451_v8  }
  0x2e   : > { %541 = vperm.xlu1 %2212, %v449_v7  }
  0x30   : > { %750 = vperm.xlu0 %2213, %v736_v9  }
  0x32   : > { %2214 = vset.pattern.permute.xlu1 %v2410_v2  ;;  %v507_v2 = vrot.slane %v487_v53, %v2628_v41 }
  0x33   : > { %625 = vperm.xlu1 %2214, %v449_v7   ;;  %v2657_v7 = vrot.slane %v643_v58, %v630_v40 }
  0x34   : > { %760 = vperm.xlu0 %2213, %v738_v10  }
  0x37   : > { %2215 = vset.pattern.permute.xlu1 %v2412_v6  ;;  %v2655_v6 = vrot.slane %v639_v57, %v630_v40 }
  0x38   : > { %977 = vperm.xlu0 %2213, %v744_v11   ;;  %698 = vperm.xlu1 %2215, %v450_v12  }
  0x3c   : > { %987 = vperm.xlu0 %2213, %v746_v13   ;;  %708 = vperm.xlu1 %2215, %v452_v14  }
  0x40   : > { %1235 = vperm.xlu0 %2213, %v1221_v15   ;;  %713 = vperm.xlu1 %2215, %v453_v16  }
  0x44   : > { %1245 = vperm.xlu0 %2213, %v1223_v17   ;;  %755 = vperm.xlu1 %2215, %v737_v18  }
  0x48   : > { %1461 = vperm.xlu0 %2213, %v1229_v19   ;;  %765 = vperm.xlu1 %2215, %v739_v20  }
  0x4c   : > { %1471 = vperm.xlu0 %2213, %v1231_v22   ;;  %982 = vperm.xlu1 %2215, %v745_v23  }
  0x50   : > { %1705 = vperm.xlu0 %2213, %v1702_v24   ;;  %992 = vperm.xlu1 %2215, %v747_v25  }
  0x54   : > { %1240 = vperm.xlu1 %2215, %v1222_v26  }
  0x58   : > { %1250 = vperm.xlu1 %2215, %v1224_v27  }
  0x5c   : > { %1466 = vperm.xlu1 %2215, %v1230_v28  }
  0x60   : > { %1476 = vperm.xlu1 %2215, %v1232_v29  }
  0x96   : > { %v530_v31 = vpop.permute.xlu1 %529  ;;  %v614_v32 = vpop.permute.xlu0 %613 }
  0x97   : > { %v580_v4 = vmul.f32 %v2638_v55, %v530_v31  ;;  %v581_v9 = vmul.f32 %v2640_v59, %v530_v31  ;;  %v582_v10 = vmul.f32 %v2642_v60, %v530_v31  ;;  %v583_v11 = vmul.f32 %v2644_v61, %v530_v31 }
  0x98   : > { %v664_v12 = vmul.f32 %v2646_v63, %v614_v32  ;;  %v665_v13 = vmul.f32 %v2653_v5, %v614_v32  ;;  %v666_v14 = vmul.f32 %v2655_v6, %v614_v32  ;;  %v667_v15 = vmul.f32 %v2657_v7, %v614_v32 }
  0x9a   : > { %v534_v34 = vpop.permute.xlu1 %533  ;;  %v2621_v36 = vpop.permute.xlu0 %621 }
  0x9b   : > { %v584_v16 = vmul.f32 %v2638_v55, %v534_v34  ;;  %v585_v23 = vmul.f32 %v2640_v59, %v534_v34  ;;  %v586_v24 = vmul.f32 %v2642_v60, %v534_v34  ;;  %v587_v25 = vmul.f32 %v2644_v61, %v534_v34 }
  0x9c   : > { %v2672_v26 = vmul.f32 %v2646_v63, %v2621_v36 }
  0x9f   : > { %v618_v45 = vpop.permute.xlu1 %617  ;;  %v457_v50 = vpop.permute.xlu0 %456 }
  0xa0   : > { %v512_v18 = vmul.f32 %v499_v0, %v457_v50  ;;  %v513_v19 = vmul.f32 %v503_v1, %v457_v50  ;;  %v514_v20 = vmul.f32 %v507_v2, %v457_v50  ;;  %v515_v22 = vmul.f32 %v511_v3, %v457_v50 }
  0xa1   : > { %v668_v32 = vmul.f32 %v2646_v63, %v618_v45  ;;  %v669_v35 = vmul.f32 %v2653_v5, %v618_v45  ;;  %v670_v37 = vmul.f32 %v2655_v6, %v618_v45  ;;  %v671_v38 = vmul.f32 %v2657_v7, %v618_v45 }
  0xa2   : > { %v597_v43 = vadd.f32 %v581_v9, %v513_v19  ;;  %v599_v34 = vadd.f32 %v583_v11, %v515_v22  ;;  %v596_v44 = vadd.f32 %v580_v4, %v512_v18  ;;  %v598_v46 = vadd.f32 %v582_v10, %v514_v20 }
  0xa3   : > { %v462_v8 = vpop.permute.xlu0 %461 }
  0xa4   : > { %v467_v62 = vpop.permute.xlu1 %466  ;;  %v516_v27 = vmul.f32 %v499_v0, %v462_v8  ;;  %v517_v28 = vmul.f32 %v503_v1, %v462_v8  ;;  %v518_v29 = vmul.f32 %v507_v2, %v462_v8  ;;  %v519_v31 = vmul.f32 %v511_v3, %v462_v8 }
  0xa5   : > { %v520_v47 = vmul.f32 %v499_v0, %v467_v62  ;;  %v521_v48 = vmul.f32 %v503_v1, %v467_v62  ;;  %v522_v49 = vmul.f32 %v507_v2, %v467_v62  ;;  %v523_v50 = vmul.f32 %v511_v3, %v467_v62 }
  0xa6   : > { %v601_v51 = vadd.f32 %v585_v23, %v517_v28  ;;  %v603_v52 = vadd.f32 %v587_v25, %v519_v31  ;;  %v600_v53 = vadd.f32 %v584_v16, %v516_v27  ;;  %v602_v54 = vadd.f32 %v586_v24, %v518_v29 }
  0xa7   : > { %v472_v39 = vpop.permute.xlu0 %471  ;;  %v681_v9 = vadd.f32 %v665_v13, %v597_v43  ;;  %v683_v4 = vadd.f32 %v667_v15, %v599_v34  ;;  %v680_v10 = vadd.f32 %v664_v12, %v596_v44  ;;  %v682_v11 = vadd.f32 %v666_v14, %v598_v46 }
  0xa8   : > { %v524_v18 = vmul.f32 %v499_v0, %v472_v39  ;;  %v525_v19 = vmul.f32 %v503_v1, %v472_v39  ;;  %v526_v62 = vmul.f32 %v507_v2, %v472_v39  ;;  %v527_v20 = vmul.f32 %v511_v3, %v472_v39 }
  0xa9   : > { %v538_v17 = vpop.permute.xlu1 %537  ;;  %v685_v16 = vadd.f32 %v669_v35, %v601_v51  ;;  %v687_v23 = vadd.f32 %v671_v38, %v603_v52  ;;  %v684_v24 = vadd.f32 %v668_v32, %v600_v53  ;;  %v686_v25 = vadd.f32 %v670_v37, %v602_v54 }
  0xaa   : > { %v588_v56 = vmul.f32 %v2638_v55, %v538_v17  ;;  %v589_v57 = vmul.f32 %v2640_v59, %v538_v17  ;;  %v590_v45 = vmul.f32 %v2642_v60, %v538_v17  ;;  %v591_v58 = vmul.f32 %v2644_v61, %v538_v17 }
  0xab   : > { %v704_v22 = vpop.permute.xlu0 %703  ;;  %v674_v34 = vmul.f32 %v2655_v6, %v2621_v36  ;;  %v675_v44 = vmul.f32 %v2657_v7, %v2621_v36 }
  0xac   : > { %v604_v27 = vadd.f32 %v588_v56, %v520_v47  ;;  %v605_v28 = vadd.f32 %v589_v57, %v521_v48  ;;  %v606_v29 = vadd.f32 %v590_v45, %v522_v49  ;;  %v607_v31 = vadd.f32 %v591_v58, %v523_v50 }
  0xad   : > { %v542_v40 = vpop.permute.xlu1 %541  ;;  %v2682_v30 = vadd.f32 %v704_v22, %v685_v16  ;;  %v2684_v17 = vadd.f32 %v704_v22, %v687_v23  ;;  %v2686_v13 = vadd.f32 %v704_v22, %v684_v24  ;;  %v2688_v12 = vadd.f32 %v704_v22, %v686_v25  ;;  %v733_v22 = vld [vmem:[%s3001_s3 + $0x8] sm:$0xff]  ;;  %v734_v16 = vld [vmem:[%s3001_s3 + $0x10] sm:$0xff]  ;;  %v735_v23 = vld [vmem:[%s3001_s3 + $0x18] sm:$0xff] }
  0xae   : > { %v592_v0 = vmul.f32 %v2638_v55, %v542_v40  ;;  %v593_v1 = vmul.f32 %v2640_v59, %v542_v40  ;;  %v594_v2 = vmul.f32 %v2642_v60, %v542_v40  ;;  %v595_v3 = vmul.f32 %v2644_v61, %v542_v40 }
  0xaf   : > { %v688_v47 = vadd.f32 %v2672_v26, %v604_v27  ;;  %v690_v53 = vadd.f32 %v674_v34, %v606_v29  ;;  %v691_v54 = vadd.f32 %v675_v44, %v607_v31  ;;  %v751_v24 = vpop.permute.xlu0 %750 }
  0xb0   : > { %v608_v48 = vadd.f32 %v592_v0, %v524_v18  ;;  %v609_v49 = vadd.f32 %v593_v1, %v525_v19  ;;  %v610_v50 = vadd.f32 %v594_v2, %v526_v62  ;;  %v611_v51 = vadd.f32 %v595_v3, %v527_v20  ;;  %v732_v20 = vld [vmem:[%s3001_s3] sm:$0xff] }
  0xb2   : > { %v626_v8 = vpop.permute.xlu1 %625 }
  0xb3   : > { %v676_v38 = vmul.f32 %v2646_v63, %v626_v8  ;;  %v677_v39 = vmul.f32 %v2653_v5, %v626_v8  ;;  %v678_v55 = vmul.f32 %v2655_v6, %v626_v8  ;;  %v679_v59 = vmul.f32 %v2657_v7, %v626_v8 }
  0xb4   : > { %v673_v63 = vmul.f32 %v2653_v5, %v2621_v36 }
  0xb5   : > { %v692_v5 = vadd.f32 %v676_v38, %v608_v48  ;;  %v693_v56 = vadd.f32 %v677_v39, %v609_v49  ;;  %v694_v6 = vadd.f32 %v678_v55, %v610_v50  ;;  %v695_v57 = vadd.f32 %v679_v59, %v611_v51 }
  0xb6   : > { %v689_v52 = vadd.f32 %v673_v63, %v605_v28 }
  0xb7   : > { %v699_v14 = vpop.permute.xlu1 %698 }
  0xb8   : > { %v2694_v15 = vadd.f32 %v699_v14, %v681_v9  ;;  %v2696_v32 = vadd.f32 %v699_v14, %v683_v4  ;;  %v2698_v35 = vadd.f32 %v699_v14, %v680_v10  ;;  %v2700_v37 = vadd.f32 %v699_v14, %v682_v11 }
  0xba   : > { %v2084_v60 = vpack.c.bf16 %v2682_v30, %v2694_v15  ;;  %v2092_v61 = vpack.c.bf16 %v2684_v17, %v2696_v32  ;;  %v2086_v40 = vpack.c.bf16 %v2686_v13, %v2698_v35  ;;  %v2094_v43 = vpack.c.bf16 %v2688_v12, %v2700_v37 }
  0xbb   : > { %v709_v46 = vpop.permute.xlu1 %708 }
  0xbc   : > { %2085 = vmatprep.subr.bf16.mxu0 %v2084_v60  ;;  %2093 = vmatprep.subr.bf16.mxu1 %v2092_v61  ;;  %v2721_v45 = vadd.f32 %v709_v46, %v688_v47  ;;  %v2723_v36 = vadd.f32 %v709_v46, %v689_v52  ;;  %v2725_v7 = vadd.f32 %v709_v46, %v690_v53 }
  0xbd   : > { %2087 = vmatpush1.bf16.msra.mxu0 %v2086_v40  ;;  %2095 = vmatpush1.bf16.msra.mxu1 %v2094_v43  ;;  %v2727_v26 = vadd.f32 %v709_v46, %v691_v54  ;;  %v761_v43 = vpop.permute.xlu0 %760 }
  0xbf   : > { %v714_v58 = vpop.permute.xlu1 %713 }
  0xc0   : > { %v2729_v8 = vadd.f32 %v714_v58, %v692_v5  ;;  %v2731_v9 = vadd.f32 %v714_v58, %v693_v56  ;;  %v2733_v4 = vadd.f32 %v714_v58, %v694_v6  ;;  %v2735_v10 = vadd.f32 %v714_v58, %v695_v57 }
  0xc2   : > { %v2088_v11 = vpack.c.bf16 %v2731_v9, %v2723_v36  ;;  %v2096_v18 = vpack.c.bf16 %v2735_v10, %v2727_v26  ;;  %v2090_v19 = vpack.c.bf16 %v2729_v8, %v2721_v45  ;;  %v2098_v62 = vpack.c.bf16 %v2733_v4, %v2725_v7 }
  0xc3   : > { %v756_v3 = vpop.permute.xlu1 %755 }
  0xc4   : > { %2089 = vmatprep.subr.bf16.mxu0 %v2088_v11  ;;  %2097 = vmatprep.subr.bf16.mxu1 %v2096_v18 }
  0xc5   : > { %2091 = vmatpush1.bf16.msra.mxu0 %v2090_v19  ;;  %2099 = vmatpush1.bf16.msra.mxu1 %v2098_v62 }
  0xc7   : > { %v766_v51 = vpop.permute.xlu1 %765 }
  0xc8   : > { %2036 = vmatmul.mubr.msk.f32.vlgmr.msra.gmra.mrb[0].mxu0 %vm768_vm0, %v732_v20  ;;  %2040 = vmatmul.mubr.msk.f32.vlgmr.msra.gmra.mrb[0].mxu1 %vm768_vm0, %v732_v20 }
  0xc9   : > { %851 = vmatprep.mubr.f32.mxu0 %v2413_v21  ;;  %940 = vmatprep.mubr.f32.mxu1 %v2413_v21 }
  0xcc   : > { %2037 = vmatmul.mubr.msk.f32.gmra.mrb[2].mxu0 %vm768_vm0, %v733_v22  ;;  %2041 = vmatmul.mubr.msk.f32.gmra.mrb[2].mxu1 %vm768_vm0, %v733_v22 }
  0xcd   : > { %857 = vmatprep.mubr.f32.mxu0 %v2413_v21  ;;  %946 = vmatprep.mubr.f32.mxu1 %v2413_v21 }
  0xd0   : > { %2038 = vmatmul.mubr.msk.f32.gmra.mrb[4].mxu0 %vm768_vm0, %v734_v16  ;;  %2042 = vmatmul.mubr.msk.f32.gmra.mrb[4].mxu1 %vm768_vm0, %v734_v16 }
  0xd1   : > { %863 = vmatprep.mubr.f32.mxu0 %v2413_v21  ;;  %952 = vmatprep.mubr.f32.mxu1 %v2413_v21 }
  0xd4   : > { %2039 = vmatmul.mubr.msk.f32.gmra.mrb[6].mxu0 %vm768_vm0, %v735_v23  ;;  %2043 = vmatmul.mubr.msk.f32.gmra.mrb[6].mxu1 %vm768_vm0, %v735_v23 }
  0xd5   : > { %1071 = vmatprep.mubr.f32.mxu0 %v2413_v21  ;;  %1160 = vmatprep.mubr.f32.mxu1 %v2413_v21 }
 0x19b   : > { %v847_v25 = vpop.f32.mrb[0].mxu0  ;;  %v936_v27 = vpop.f32.mrb[0].mxu1 }
 0x19c   : > { %v848_v28 = vadd.f32 %v847_v25, %v751_v24  ;;  %v937_v29 = vadd.f32 %v936_v27, %v751_v24  ;;  %v849_v31 = vpop.f32.mrb[1].mxu0  ;;  %v938_v0 = vpop.f32.mrb[1].mxu1 }
 0x19d   : > { %v850_v1 = vadd.f32 %v849_v31, %v751_v24  ;;  %v939_v2 = vadd.f32 %v938_v0, %v751_v24 }
 0x19e   : > { %2216 = vtanh.f32 %v848_v28 }
 0x19f   : > { %2218 = vtanh.f32 %v937_v29  ;;  %v853_v14 = vpop.f32.mrb[2].mxu0  ;;  %v942_v38 = vpop.f32.mrb[2].mxu1 }
 0x1a0   : > { %2220 = vtanh.f32 %v850_v1  ;;  %v854_v39 = vadd.f32 %v853_v14, %v756_v3  ;;  %v943_v55 = vadd.f32 %v942_v38, %v756_v3  ;;  %v855_v59 = vpop.f32.mrb[3].mxu0  ;;  %v944_v60 = vpop.f32.mrb[3].mxu1 }
 0x1a1   : > { %2222 = vtanh.f32 %v939_v2  ;;  %v856_v61 = vadd.f32 %v855_v59, %v756_v3  ;;  %v945_v40 = vadd.f32 %v944_v60, %v756_v3 }
 0x1a2   : > { %2224 = vtanh.f32 %v854_v39 }
 0x1a3   : > { %2226 = vtanh.f32 %v943_v55  ;;  %v859_v63 = vpop.f32.mrb[4].mxu0  ;;  %v948_v34 = vpop.f32.mrb[4].mxu1 }
 0x1a4   : > { %2228 = vtanh.f32 %v856_v61  ;;  %v860_v44 = vadd.f32 %v859_v63, %v761_v43  ;;  %v949_v46 = vadd.f32 %v948_v34, %v761_v43  ;;  %v861_v47 = vpop.f32.mrb[5].mxu0  ;;  %v950_v48 = vpop.f32.mrb[5].mxu1  ;;  %v740_v61 = vld [vmem:[%s3003_s5] sm:$0xff]  ;;  %v743_v63 = vld [vmem:[%s3003_s5 + $0x18] sm:$0xff] }
 0x1a5   : > { %2230 = vtanh.f32 %v945_v40  ;;  %v862_v49 = vadd.f32 %v861_v47, %v761_v43  ;;  %v951_v50 = vadd.f32 %v950_v48, %v761_v43  ;;  %v741_v40 = vld [vmem:[%s3003_s5 + $0x8] sm:$0xff]  ;;  %v742_v43 = vld [vmem:[%s3003_s5 + $0x10] sm:$0xff]  ;;  %v978_v34 = vpop.permute.xlu0 %977 }
 0x1a6   : > { %2232 = vtanh.f32 %v860_v44 }
 0x1a7   : > { %2234 = vtanh.f32 %v949_v46  ;;  %v865_v52 = vpop.f32.mrb[6].mxu0  ;;  %v954_v53 = vpop.f32.mrb[6].mxu1 }
 0x1a8   : > { %v2217_v54 = vpop.eup %2216  ;;  %2236 = vtanh.f32 %v862_v49  ;;  %v866_v5 = vadd.f32 %v865_v52, %v766_v51  ;;  %v955_v56 = vadd.f32 %v954_v53, %v766_v51  ;;  %v867_v6 = vpop.f32.mrb[7].mxu0 }
 0x1a9   : > { %v956_v57 = vpop.f32.mrb[7].mxu1  ;;  %v2219_v58 = vpop.eup %2218  ;;  %2238 = vtanh.f32 %v951_v50  ;;  %v868_v11 = vadd.f32 %v867_v6, %v766_v51 }
 0x1aa   : > { %v957_v18 = vadd.f32 %v956_v57, %v766_v51  ;;  %v2221_v19 = vpop.eup %2220  ;;  %2240 = vtanh.f32 %v866_v5  ;;  %v983_v53 = vpop.permute.xlu1 %982 }
 0x1ab   : > { %v2223_v62 = vpop.eup %2222  ;;  %2242 = vtanh.f32 %v955_v56 }
 0x1ac   : > { %v2225_v20 = vpop.eup %2224  ;;  %2244 = vtanh.f32 %v868_v11 }
 0x1ad   : > { %v2227_v22 = vpop.eup %2226  ;;  %2246 = vtanh.f32 %v957_v18  ;;  %v2102_v16 = vpack.c.bf16 %v2225_v20, %v2217_v54 }
 0x1ae   : > { %v2229_v23 = vpop.eup %2228  ;;  %v2110_v24 = vpack.c.bf16 %v2227_v22, %v2219_v58 }
 0x1af   : > { %v2231_v25 = vpop.eup %2230  ;;  %v2100_v27 = vpack.c.bf16 %v2229_v23, %v2221_v19  ;;  %v988_v19 = vpop.permute.xlu0 %987 }
 0x1b0   : > { %v2233_v28 = vpop.eup %2232  ;;  %v2108_v29 = vpack.c.bf16 %v2231_v25, %v2223_v62 }
 0x1b1   : > { %v2235_v31 = vpop.eup %2234  ;;  %2101 = vmatprep.subr.bf16.mxu0 %v2100_v27 }
 0x1b2   : > { %v2237_v0 = vpop.eup %2236  ;;  %2109 = vmatprep.subr.bf16.mxu1 %v2108_v29  ;;  %2103 = vmatpush1.bf16.msra.mxu0 %v2102_v16 }
 0x1b3   : > { %v2239_v1 = vpop.eup %2238  ;;  %2111 = vmatpush1.bf16.msra.mxu1 %v2110_v24 }
 0x1b4   : > { %v2241_v2 = vpop.eup %2240 }
 0x1b5   : > { %v2243_v3 = vpop.eup %2242  ;;  %v2106_v14 = vpack.c.bf16 %v2241_v2, %v2233_v28  ;;  %v993_v28 = vpop.permute.xlu1 %992 }
 0x1b6   : > { %v2245_v38 = vpop.eup %2244  ;;  %v2114_v39 = vpack.c.bf16 %v2243_v3, %v2235_v31 }
 0x1b7   : > { %v2247_v55 = vpop.eup %2246  ;;  %v2104_v59 = vpack.c.bf16 %v2245_v38, %v2237_v0 }
 0x1b8   : > { %v2112_v60 = vpack.c.bf16 %v2247_v55, %v2239_v1 }
 0x1b9   : > { %2105 = vmatprep.subr.bf16.mxu0 %v2104_v59 }
 0x1ba   : > { %2113 = vmatprep.subr.bf16.mxu1 %v2112_v60  ;;  %2107 = vmatpush1.bf16.msra.mxu0 %v2106_v14 }
 0x1bb   : > { %2115 = vmatpush1.bf16.msra.mxu1 %v2114_v39 }
 0x1bd   : > { %2044 = vmatmul.mubr.msk.f32.vlgmr.msra.gmra.mrb[8].mxu0 %vm768_vm0, %v740_v61 }
 0x1be   : > { %2048 = vmatmul.mubr.msk.f32.vlgmr.msra.gmra.mrb[8].mxu1 %vm768_vm0, %v740_v61  ;;  %1077 = vmatprep.mubr.f32.mxu0 %v2413_v21 }
 0x1bf   : > { %1166 = vmatprep.mubr.f32.mxu1 %v2413_v21 }
 0x1c1   : > { %2045 = vmatmul.mubr.msk.f32.gmra.mrb[10].mxu0 %vm768_vm0, %v741_v40 }
 0x1c2   : > { %2049 = vmatmul.mubr.msk.f32.gmra.mrb[10].mxu1 %vm768_vm0, %v741_v40  ;;  %1083 = vmatprep.mubr.f32.mxu0 %v2413_v21 }
 0x1c3   : > { %1172 = vmatprep.mubr.f32.mxu1 %v2413_v21 }
 0x1c5   : > { %2046 = vmatmul.mubr.msk.f32.gmra.mrb[12].mxu0 %vm768_vm0, %v742_v43 }
 0x1c6   : > { %2050 = vmatmul.mubr.msk.f32.gmra.mrb[12].mxu1 %vm768_vm0, %v742_v43  ;;  %1089 = vmatprep.mubr.f32.mxu0 %v2413_v21 }
 0x1c7   : > { %1178 = vmatprep.mubr.f32.mxu1 %v2413_v21 }
 0x1c9   : > { %2047 = vmatmul.mubr.msk.f32.gmra.mrb[14].mxu0 %vm768_vm0, %v743_v63 }
 0x1ca   : > { %2051 = vmatmul.mubr.msk.f32.gmra.mrb[14].mxu1 %vm768_vm0, %v743_v63  ;;  %1329 = vmatprep.mubr.f32.mxu0 %v2413_v21 }
 0x1cb   : > { %1418 = vmatprep.mubr.f32.mxu1 %v2413_v21 }
 0x290   : > { %v1073_v44 = vpop.f32.mrb[8].mxu0 }
 0x291   : > { %v1074_v46 = vadd.f32 %v1073_v44, %v978_v34  ;;  %v1162_v47 = vpop.f32.mrb[8].mxu1  ;;  %v1075_v48 = vpop.f32.mrb[9].mxu0 }
 0x292   : > { %v1163_v49 = vadd.f32 %v1162_v47, %v978_v34  ;;  %v1076_v50 = vadd.f32 %v1075_v48, %v978_v34  ;;  %v1164_v51 = vpop.f32.mrb[9].mxu1 }
 0x293   : > { %2248 = vtanh.f32 %v1074_v46  ;;  %v1165_v52 = vadd.f32 %v1164_v51, %v978_v34 }
 0x294   : > { %2250 = vtanh.f32 %v1163_v49  ;;  %v1079_v54 = vpop.f32.mrb[10].mxu0 }
 0x295   : > { %2252 = vtanh.f32 %v1076_v50  ;;  %v1080_v5 = vadd.f32 %v1079_v54, %v983_v53  ;;  %v1168_v56 = vpop.f32.mrb[10].mxu1  ;;  %v1081_v6 = vpop.f32.mrb[11].mxu0 }
 0x296   : > { %2254 = vtanh.f32 %v1165_v52  ;;  %v1169_v57 = vadd.f32 %v1168_v56, %v983_v53  ;;  %v1082_v58 = vadd.f32 %v1081_v6, %v983_v53  ;;  %v1170_v11 = vpop.f32.mrb[11].mxu1 }
 0x297   : > { %2256 = vtanh.f32 %v1080_v5  ;;  %v1171_v18 = vadd.f32 %v1170_v11, %v983_v53 }
 0x298   : > { %2258 = vtanh.f32 %v1169_v57  ;;  %v1085_v62 = vpop.f32.mrb[12].mxu0 }
 0x299   : > { %2260 = vtanh.f32 %v1082_v58  ;;  %v1086_v20 = vadd.f32 %v1085_v62, %v988_v19  ;;  %v1174_v22 = vpop.f32.mrb[12].mxu1  ;;  %v1087_v16 = vpop.f32.mrb[13].mxu0  ;;  %v1220_v62 = vld [vmem:[%s3005_s7 + $0x18] sm:$0xff] }
 0x29a   : > { %2262 = vtanh.f32 %v1171_v18  ;;  %v1175_v23 = vadd.f32 %v1174_v22, %v988_v19  ;;  %v1088_v24 = vadd.f32 %v1087_v16, %v988_v19  ;;  %v1176_v25 = vpop.f32.mrb[13].mxu1 }
 0x29b   : > { %2264 = vtanh.f32 %v1086_v20  ;;  %v1177_v27 = vadd.f32 %v1176_v25, %v988_v19  ;;  %v1236_v20 = vpop.permute.xlu0 %1235 }
 0x29c   : > { %2266 = vtanh.f32 %v1175_v23  ;;  %v1091_v29 = vpop.f32.mrb[14].mxu0 }
 0x29d   : > { %v2249_v31 = vpop.eup %2248  ;;  %2268 = vtanh.f32 %v1088_v24  ;;  %v1092_v0 = vadd.f32 %v1091_v29, %v993_v28  ;;  %v1180_v1 = vpop.f32.mrb[14].mxu1 }
 0x29e   : > { %v1093_v2 = vpop.f32.mrb[15].mxu0  ;;  %v2251_v3 = vpop.eup %2250  ;;  %2270 = vtanh.f32 %v1177_v27  ;;  %v1181_v14 = vadd.f32 %v1180_v1, %v993_v28 }
 0x29f   : > { %v1094_v38 = vadd.f32 %v1093_v2, %v993_v28  ;;  %v1182_v39 = vpop.f32.mrb[15].mxu1  ;;  %v2253_v55 = vpop.eup %2252  ;;  %2272 = vtanh.f32 %v1092_v0 }
 0x2a0   : > { %v1183_v59 = vadd.f32 %v1182_v39, %v993_v28  ;;  %v2255_v60 = vpop.eup %2254  ;;  %2274 = vtanh.f32 %v1181_v14  ;;  %v2805_v44 = vadd.f32 %v2253_v55, %v2694_v15 }
 0x2a1   : > { %v2257_v61 = vpop.eup %2256  ;;  %2276 = vtanh.f32 %v1094_v38  ;;  %v2814_v49 = vadd.f32 %v2255_v60, %v2696_v32 }
 0x2a2   : > { %v2259_v40 = vpop.eup %2258  ;;  %2278 = vtanh.f32 %v1183_v59  ;;  %v2802_v63 = vadd.f32 %v2257_v61, %v2686_v13  ;;  %v2820_v13 = vadd.f32 %v2249_v31, %v2698_v35  ;;  %v1241_v31 = vpop.permute.xlu1 %1240 }
 0x2a3   : > { %v2261_v43 = vpop.eup %2260  ;;  %v2811_v47 = vadd.f32 %v2259_v40, %v2688_v12  ;;  %v1246_v59 = vpop.permute.xlu0 %1245 }
 0x2a4   : > { %v2263_v34 = vpop.eup %2262  ;;  %v2808_v46 = vadd.f32 %v2261_v43, %v2682_v30  ;;  %v2825_v30 = vadd.f32 %v2251_v3, %v2700_v37  ;;  %v2118_v32 = vpack.c.bf16 %v2802_v63, %v2820_v13 }
 0x2a5   : > { %v2265_v48 = vpop.eup %2264  ;;  %v2817_v50 = vadd.f32 %v2263_v34, %v2684_v17 }
 0x2a6   : > { %v2267_v51 = vpop.eup %2266  ;;  %v2116_v15 = vpack.c.bf16 %v2808_v46, %v2805_v44  ;;  %v2126_v17 = vpack.c.bf16 %v2811_v47, %v2825_v30  ;;  %v2852_v19 = vadd.f32 %v2265_v48, %v2721_v45  ;;  %v1217_v45 = vld [vmem:[%s3005_s7] sm:$0xff] }
 0x2a7   : > { %v2269_v52 = vpop.eup %2268  ;;  %v2124_v12 = vpack.c.bf16 %v2817_v50, %v2814_v49 }
 0x2a8   : > { %v2271_v53 = vpop.eup %2270  ;;  %2117 = vmatprep.subr.bf16.mxu0 %v2116_v15  ;;  %v2837_v6 = vadd.f32 %v2269_v52, %v2723_v36  ;;  %v2857_v36 = vadd.f32 %v2267_v51, %v2725_v7  ;;  %v1218_v7 = vld [vmem:[%s3005_s7 + $0x8] sm:$0xff]  ;;  %v1251_v52 = vpop.permute.xlu1 %1250 }
 0x2a9   : > { %v2273_v35 = vpop.eup %2272  ;;  %2125 = vmatprep.subr.bf16.mxu1 %v2124_v12  ;;  %2119 = vmatpush1.bf16.msra.mxu0 %v2118_v32  ;;  %v2846_v11 = vadd.f32 %v2271_v53, %v2727_v26 }
 0x2aa   : > { %v2275_v54 = vpop.eup %2274  ;;  %2127 = vmatpush1.bf16.msra.mxu1 %v2126_v17  ;;  %v2834_v37 = vadd.f32 %v2273_v35, %v2729_v8 }
 0x2ab   : > { %v2277_v5 = vpop.eup %2276  ;;  %v2843_v58 = vadd.f32 %v2275_v54, %v2733_v4 }
 0x2ac   : > { %v2279_v56 = vpop.eup %2278  ;;  %v2840_v57 = vadd.f32 %v2277_v5, %v2731_v9  ;;  %v2122_v4 = vpack.c.bf16 %v2834_v37, %v2852_v19 }
 0x2ad   : > { %v2849_v18 = vadd.f32 %v2279_v56, %v2735_v10  ;;  %v2130_v26 = vpack.c.bf16 %v2843_v58, %v2857_v36  ;;  %v1219_v10 = vld [vmem:[%s3005_s7 + $0x10] sm:$0xff] }
 0x2ae   : > { %v2120_v8 = vpack.c.bf16 %v2840_v57, %v2837_v6 }
 0x2af   : > { %v2128_v9 = vpack.c.bf16 %v2849_v18, %v2846_v11 }
 0x2b0   : > { %2121 = vmatprep.subr.bf16.mxu0 %v2120_v8 }
 0x2b1   : > { %2129 = vmatprep.subr.bf16.mxu1 %v2128_v9  ;;  %2123 = vmatpush1.bf16.msra.mxu0 %v2122_v4 }
 0x2b2   : > { %2131 = vmatpush1.bf16.msra.mxu1 %v2130_v26 }
 0x2b4   : > { %2052 = vmatmul.mubr.msk.f32.vlgmr.msra.gmra.mrb[16].mxu0 %vm768_vm0, %v1217_v45 }
 0x2b5   : > { %2056 = vmatmul.mubr.msk.f32.vlgmr.msra.gmra.mrb[16].mxu1 %vm768_vm0, %v1217_v45  ;;  %1335 = vmatprep.mubr.f32.mxu0 %v2413_v21 }
 0x2b6   : > { %1424 = vmatprep.mubr.f32.mxu1 %v2413_v21 }
 0x2b8   : > { %2053 = vmatmul.mubr.msk.f32.gmra.mrb[18].mxu0 %vm768_vm0, %v1218_v7 }
 0x2b9   : > { %2057 = vmatmul.mubr.msk.f32.gmra.mrb[18].mxu1 %vm768_vm0, %v1218_v7  ;;  %1341 = vmatprep.mubr.f32.mxu0 %v2413_v21 }
 0x2ba   : > { %1430 = vmatprep.mubr.f32.mxu1 %v2413_v21 }
 0x2bc   : > { %2054 = vmatmul.mubr.msk.f32.gmra.mrb[20].mxu0 %vm768_vm0, %v1219_v10 }
 0x2bd   : > { %2058 = vmatmul.mubr.msk.f32.gmra.mrb[20].mxu1 %vm768_vm0, %v1219_v10  ;;  %1347 = vmatprep.mubr.f32.mxu0 %v2413_v21 }
 0x2be   : > { %1436 = vmatprep.mubr.f32.mxu1 %v2413_v21 }
 0x2c0   : > { %2055 = vmatmul.mubr.msk.f32.gmra.mrb[22].mxu0 %vm768_vm0, %v1220_v62 }
 0x2c1   : > { %2059 = vmatmul.mubr.msk.f32.gmra.mrb[22].mxu1 %vm768_vm0, %v1220_v62  ;;  %1555 = vmatprep.mubr.f32.mxu0 %v2413_v21 }
 0x2c2   : > { %1644 = vmatprep.mubr.f32.mxu1 %v2413_v21 }
 0x387   : > { %v1331_v22 = vpop.f32.mrb[16].mxu0 }
 0x388   : > { %v1332_v16 = vadd.f32 %v1331_v22, %v1236_v20  ;;  %v1420_v23 = vpop.f32.mrb[16].mxu1  ;;  %v1333_v24 = vpop.f32.mrb[17].mxu0 }
 0x389   : > { %v1421_v25 = vadd.f32 %v1420_v23, %v1236_v20  ;;  %v1334_v27 = vadd.f32 %v1333_v24, %v1236_v20  ;;  %v1422_v28 = vpop.f32.mrb[17].mxu1 }
 0x38a   : > { %2280 = vtanh.f32 %v1332_v16  ;;  %v1423_v29 = vadd.f32 %v1422_v28, %v1236_v20 }
 0x38b   : > { %2282 = vtanh.f32 %v1421_v25  ;;  %v1337_v0 = vpop.f32.mrb[18].mxu0 }
 0x38c   : > { %2284 = vtanh.f32 %v1334_v27  ;;  %v1338_v1 = vadd.f32 %v1337_v0, %v1241_v31  ;;  %v1426_v2 = vpop.f32.mrb[18].mxu1  ;;  %v1339_v3 = vpop.f32.mrb[19].mxu0 }
 0x38d   : > { %2286 = vtanh.f32 %v1423_v29  ;;  %v1427_v14 = vadd.f32 %v1426_v2, %v1241_v31  ;;  %v1340_v38 = vadd.f32 %v1339_v3, %v1241_v31  ;;  %v1428_v39 = vpop.f32.mrb[19].mxu1 }
 0x38e   : > { %2288 = vtanh.f32 %v1338_v1  ;;  %v1429_v55 = vadd.f32 %v1428_v39, %v1241_v31  ;;  %v1225_v39 = vld [vmem:[%s3007_s9] sm:$0xff] }
 0x38f   : > { %2290 = vtanh.f32 %v1427_v14  ;;  %v1343_v60 = vpop.f32.mrb[20].mxu0 }
 0x390   : > { %2292 = vtanh.f32 %v1340_v38  ;;  %v1344_v61 = vadd.f32 %v1343_v60, %v1246_v59  ;;  %v1432_v40 = vpop.f32.mrb[20].mxu1  ;;  %v1345_v43 = vpop.f32.mrb[21].mxu0  ;;  %v1228_v60 = vld [vmem:[%s3007_s9 + $0x18] sm:$0xff] }
 0x391   : > { %2294 = vtanh.f32 %v1429_v55  ;;  %v1433_v34 = vadd.f32 %v1432_v40, %v1246_v59  ;;  %v1346_v48 = vadd.f32 %v1345_v43, %v1246_v59  ;;  %v1434_v51 = vpop.f32.mrb[21].mxu1  ;;  %v1226_v55 = vld [vmem:[%s3007_s9 + $0x8] sm:$0xff] }
 0x392   : > { %2296 = vtanh.f32 %v1344_v61  ;;  %v1435_v15 = vadd.f32 %v1434_v51, %v1246_v59  ;;  %v1227_v59 = vld [vmem:[%s3007_s9 + $0x10] sm:$0xff]  ;;  %v1462_v61 = vpop.permute.xlu0 %1461 }
 0x393   : > { %2298 = vtanh.f32 %v1433_v34  ;;  %v1349_v12 = vpop.f32.mrb[22].mxu0 }
 0x394   : > { %v2281_v32 = vpop.eup %2280  ;;  %2300 = vtanh.f32 %v1346_v48  ;;  %v1350_v53 = vadd.f32 %v1349_v12, %v1251_v52  ;;  %v1438_v17 = vpop.f32.mrb[22].mxu1 }
 0x395   : > { %v1351_v35 = vpop.f32.mrb[23].mxu0  ;;  %v2283_v54 = vpop.eup %2282  ;;  %2302 = vtanh.f32 %v1435_v15  ;;  %v1439_v5 = vadd.f32 %v1438_v17, %v1251_v52 }
 0x396   : > { %v1352_v56 = vadd.f32 %v1351_v35, %v1251_v52  ;;  %v1440_v8 = vpop.f32.mrb[23].mxu1  ;;  %v2285_v9 = vpop.eup %2284  ;;  %2304 = vtanh.f32 %v1350_v53 }
 0x397   : > { %v1441_v4 = vadd.f32 %v1440_v8, %v1251_v52  ;;  %v2287_v26 = vpop.eup %2286  ;;  %2306 = vtanh.f32 %v1439_v5 }
 0x398   : > { %v2289_v45 = vpop.eup %2288  ;;  %2308 = vtanh.f32 %v1352_v56 }
 0x399   : > { %v2291_v7 = vpop.eup %2290  ;;  %2310 = vtanh.f32 %v1441_v4  ;;  %v2134_v10 = vpack.c.bf16 %v2289_v45, %v2281_v32  ;;  %v1467_v32 = vpop.permute.xlu1 %1466 }
 0x39a   : > { %v2293_v62 = vpop.eup %2292  ;;  %v2142_v20 = vpack.c.bf16 %v2291_v7, %v2283_v54 }
 0x39b   : > { %v2295_v22 = vpop.eup %2294  ;;  %v2132_v16 = vpack.c.bf16 %v2293_v62, %v2285_v9  ;;  %v1472_v9 = vpop.permute.xlu0 %1471 }
 0x39c   : > { %v2297_v23 = vpop.eup %2296  ;;  %v2140_v24 = vpack.c.bf16 %v2295_v22, %v2287_v26 }
 0x39d   : > { %v2299_v25 = vpop.eup %2298  ;;  %2133 = vmatprep.subr.bf16.mxu0 %v2132_v16  ;;  %v1477_v16 = vpop.permute.xlu1 %1476 }
 0x39e   : > { %v2301_v27 = vpop.eup %2300  ;;  %2141 = vmatprep.subr.bf16.mxu1 %v2140_v24  ;;  %2135 = vmatpush1.bf16.msra.mxu0 %v2134_v10 }
 0x39f   : > { %v2303_v28 = vpop.eup %2302  ;;  %2143 = vmatpush1.bf16.msra.mxu1 %v2142_v20 }
 0x3a0   : > { %v2305_v29 = vpop.eup %2304 }
 0x3a1   : > { %v2307_v31 = vpop.eup %2306  ;;  %v2138_v0 = vpack.c.bf16 %v2305_v29, %v2297_v23 }
 0x3a2   : > { %v2309_v1 = vpop.eup %2308  ;;  %v2146_v2 = vpack.c.bf16 %v2307_v31, %v2299_v25 }
 0x3a3   : > { %v2311_v3 = vpop.eup %2310  ;;  %v2136_v14 = vpack.c.bf16 %v2309_v1, %v2301_v27 }
 0x3a4   : > { %v2144_v38 = vpack.c.bf16 %v2311_v3, %v2303_v28 }
 0x3a5   : > { %2137 = vmatprep.subr.bf16.mxu0 %v2136_v14 }
 0x3a6   : > { %2145 = vmatprep.subr.bf16.mxu1 %v2144_v38  ;;  %2139 = vmatpush1.bf16.msra.mxu0 %v2138_v0 }
 0x3a7   : > { %2147 = vmatpush1.bf16.msra.mxu1 %v2146_v2 }
 0x3a9   : > { %2060 = vmatmul.mubr.msk.f32.vlgmr.msra.gmra.mrb[24].mxu0 %vm768_vm0, %v1225_v39 }
 0x3aa   : > { %2064 = vmatmul.mubr.msk.f32.vlgmr.msra.gmra.mrb[24].mxu1 %vm768_vm0, %v1225_v39  ;;  %1561 = vmatprep.mubr.f32.mxu0 %v2413_v21 }
 0x3ab   : > { %1650 = vmatprep.mubr.f32.mxu1 %v2413_v21 }
 0x3ad   : > { %2061 = vmatmul.mubr.msk.f32.gmra.mrb[26].mxu0 %vm768_vm0, %v1226_v55 }
 0x3ae   : > { %2065 = vmatmul.mubr.msk.f32.gmra.mrb[26].mxu1 %vm768_vm0, %v1226_v55  ;;  %1567 = vmatprep.mubr.f32.mxu0 %v2413_v21 }
 0x3af   : > { %1656 = vmatprep.mubr.f32.mxu1 %v2413_v21 }
 0x3b1   : > { %2062 = vmatmul.mubr.msk.f32.gmra.mrb[28].mxu0 %vm768_vm0, %v1227_v59 }
 0x3b2   : > { %2066 = vmatmul.mubr.msk.f32.gmra.mrb[28].mxu1 %vm768_vm0, %v1227_v59  ;;  %1573 = vmatprep.mubr.f32.mxu0 %v2413_v21 }
 0x3b3   : > { %1662 = vmatprep.mubr.f32.mxu1 %v2413_v21 }
 0x3b5   : > { %2063 = vmatmul.mubr.msk.f32.gmra.mrb[30].mxu0 %vm768_vm0, %v1228_v60 }
 0x3b6   : > { %2067 = vmatmul.mubr.msk.f32.gmra.mrb[30].mxu1 %vm768_vm0, %v1228_v60  ;;  %1779 = vmatprep.mubr.f32.mxu0 %v2413_v21 }
 0x3b7   : > { %1850 = vmatprep.mubr.f32.mxu1 %v2413_v21 }
 0x47c   : > { %v1557_v40 = vpop.f32.mrb[24].mxu0 }
 0x47d   : > { %v1558_v43 = vadd.f32 %v1557_v40, %v1462_v61  ;;  %v1646_v34 = vpop.f32.mrb[24].mxu1  ;;  %v1559_v48 = vpop.f32.mrb[25].mxu0 }
 0x47e   : > { %v1647_v51 = vadd.f32 %v1646_v34, %v1462_v61  ;;  %v1560_v15 = vadd.f32 %v1559_v48, %v1462_v61  ;;  %v1648_v52 = vpop.f32.mrb[25].mxu1 }
 0x47f   : > { %2312 = vtanh.f32 %v1558_v43  ;;  %v1649_v12 = vadd.f32 %v1648_v52, %v1462_v61 }
 0x480   : > { %2314 = vtanh.f32 %v1647_v51  ;;  %v1563_v53 = vpop.f32.mrb[26].mxu0 }
 0x481   : > { %2316 = vtanh.f32 %v1560_v15  ;;  %v1564_v17 = vadd.f32 %v1563_v53, %v1467_v32  ;;  %v1652_v35 = vpop.f32.mrb[26].mxu1  ;;  %v1565_v54 = vpop.f32.mrb[27].mxu0 }
 0x482   : > { %2318 = vtanh.f32 %v1649_v12  ;;  %v1653_v5 = vadd.f32 %v1652_v35, %v1467_v32  ;;  %v1566_v21 = vadd.f32 %v1565_v54, %v1467_v32  ;;  %v1654_v56 = vpop.f32.mrb[27].mxu1 }
 0x483   : > { %2320 = vtanh.f32 %v1564_v17  ;;  %v1655_v8 = vadd.f32 %v1654_v56, %v1467_v32 }
 0x484   : > { %2322 = vtanh.f32 %v1653_v5  ;;  %v1569_v4 = vpop.f32.mrb[28].mxu0 }
 0x485   : > { %2324 = vtanh.f32 %v1566_v21  ;;  %v1570_v26 = vadd.f32 %v1569_v4, %v1472_v9  ;;  %v1658_v45 = vpop.f32.mrb[28].mxu1  ;;  %v1571_v7 = vpop.f32.mrb[29].mxu0 }
 0x486   : > { %2326 = vtanh.f32 %v1655_v8  ;;  %v1659_v10 = vadd.f32 %v1658_v45, %v1472_v9  ;;  %v1572_v62 = vadd.f32 %v1571_v7, %v1472_v9  ;;  %v1660_v20 = vpop.f32.mrb[29].mxu1 }
 0x487   : > { %2328 = vtanh.f32 %v1570_v26  ;;  %v1661_v22 = vadd.f32 %v1660_v20, %v1472_v9 }
 0x488   : > { %2330 = vtanh.f32 %v1659_v10  ;;  %v1575_v23 = vpop.f32.mrb[30].mxu0 }
 0x489   : > { %v2313_v24 = vpop.eup %2312  ;;  %2332 = vtanh.f32 %v1572_v62  ;;  %v1576_v25 = vadd.f32 %v1575_v23, %v1477_v16  ;;  %v1664_v27 = vpop.f32.mrb[30].mxu1 }
 0x48a   : > { %v1577_v28 = vpop.f32.mrb[31].mxu0  ;;  %v2315_v29 = vpop.eup %2314  ;;  %2334 = vtanh.f32 %v1661_v22  ;;  %v1665_v31 = vadd.f32 %v1664_v27, %v1477_v16  ;;  %v1685_v55 = vadd.f32 %v2313_v24, %v2820_v13 }
 0x48b   : > { %v1578_v0 = vadd.f32 %v1577_v28, %v1477_v16  ;;  %v1666_v1 = vpop.f32.mrb[31].mxu1  ;;  %v2317_v2 = vpop.eup %2316  ;;  %2336 = vtanh.f32 %v1576_v25  ;;  %v1687_v61 = vadd.f32 %v2315_v29, %v2825_v30 }
 0x48c   : > { %v1667_v3 = vadd.f32 %v1666_v1, %v1477_v16  ;;  %v2319_v14 = vpop.eup %2318  ;;  %2338 = vtanh.f32 %v1665_v31  ;;  %v1686_v34 = vadd.f32 %v2317_v2, %v2805_v44  ;;  %v1706_v2 = vpop.permute.xlu0 %1705 }
 0x48d   : > { %v2321_v38 = vpop.eup %2320  ;;  %2340 = vtanh.f32 %v1578_v0  ;;  %v1688_v52 = vadd.f32 %v2319_v14, %v2814_v49  ;;  %v2414_v14 = vmov 1966171168  }
 0x48e   : > { %v2323_v39 = vpop.eup %2322  ;;  %2342 = vtanh.f32 %v1667_v3  ;;  %v1689_v59 = vadd.f32 %v2321_v38, %v2802_v63  ;;  %v1928_v38 = vunpack.c.l.s4 %v2414_v14 }
 0x48f   : > { %v2325_v60 = vpop.eup %2324  ;;  %v1691_v40 = vadd.f32 %v2323_v39, %v2811_v47  ;;  %v1711_v39 = vrot.slane %v1706_v2, %v2628_v41 }
 0x490   : > { %v2327_v43 = vpop.eup %2326  ;;  %v1690_v48 = vadd.f32 %v2325_v60, %v2808_v46  ;;  %v2150_v51 = vpack.c.bf16 %v1689_v59, %v1685_v55 }
 0x491   : > { %v2329_v15 = vpop.eup %2328  ;;  %v1692_v12 = vadd.f32 %v2327_v43, %v2817_v50  ;;  %v2158_v32 = vpack.c.bf16 %v1691_v40, %v1687_v61  ;;  %v1929_v40 = vunpack.c.0.s8 %v1928_v38 }
 0x492   : > { %v2331_v13 = vpop.eup %2330  ;;  %v2148_v53 = vpack.c.bf16 %v1690_v48, %v1686_v34  ;;  %v1693_v44 = vadd.f32 %v2329_v15, %v2852_v19 }
 0x493   : > { %v2333_v63 = vpop.eup %2332  ;;  %v2156_v17 = vpack.c.bf16 %v1692_v12, %v1688_v52  ;;  %v1695_v49 = vadd.f32 %v2331_v13, %v2857_v36 }
 0x494   : > { %v2335_v35 = vpop.eup %2334  ;;  %2149 = vmatprep.subr.bf16.mxu0 %v2148_v53  ;;  %v1694_v21 = vadd.f32 %v2333_v63, %v2837_v6  ;;  %v2344_v6 = vld [vmem:[%s2618_s25] sm:$0x77] }
 0x495   : > { %v2337_v30 = vpop.eup %2336  ;;  %2157 = vmatprep.subr.bf16.mxu1 %v2156_v17  ;;  %2151 = vmatpush1.bf16.msra.mxu0 %v2150_v51  ;;  %v1696_v9 = vadd.f32 %v2335_v35, %v2846_v11  ;;  %v2345_v11 = vld [vmem:[%s2618_s25 + $0x8] sm:$0x77]  ;;  %v2072_v45 = vrot.slane %v2344_v6, 10  ;;  %v1873_v20 = vsub.f32 1.0, %v2344_v6  ;;  %s434_s25 = sand.u32 1, %s2400_s28   ;;  %v1932_v17 = vsub.s32 %v1929_v40, %v2613_v33 }
 0x496   : > { %v2339_v47 = vpop.eup %2338  ;;  %2159 = vmatpush1.bf16.msra.mxu1 %v2158_v32  ;;  %v1697_v46 = vadd.f32 %v2337_v30, %v2834_v37  ;;  %v2071_v36 = vrot.slane %v2345_v11, 9  ;;  %v2073_v10 = vrot.slane %v2345_v11, 10  ;;  %v1874_v16 = vsub.f32 1.0, %v2345_v11  ;;  %s2033_s23 = sshll.u32 %s434_s25, 2  ;;  %s1956_s21 = scalar_lea.sflag [#allocation4], %s434_s25 }
 0x497   : > { %v2341_v54 = vpop.eup %2340  ;;  %v1699_v50 = vadd.f32 %v2339_v47, %v2843_v58  ;;  %v1701_v58 = vld [vmem:[%s3009_s11] sm:$0x1]  ;;  %v2074_v24 = vrot.slane %v1873_v20, 9  ;;  %v2076_v29 = vrot.slane %v1873_v20, 10  ;;  %s436_s26 = scalar_lea.vmem [#allocation3], %s2033_s23  ;;  %s2350_s23 = sshll.u32 %s2415_s12, 4  ;;  %s2351_s23 = int_to_ptr.vmem [resolvable:$false] %s2350_s23 }
 0x498   : > { %v2343_v5 = vpop.eup %2342  ;;  %v1698_v56 = vadd.f32 %v2341_v54, %v2840_v57  ;;  %v2154_v8 = vpack.c.bf16 %v1697_v46, %v1693_v44  ;;  %v2070_v57 = vrot.slane %v2344_v6, 9  ;;  %v1864_v7 = vmul.f32 %v2345_v11, %v2071_v36  ;;  %s1970_s1 = sshll.u32 %s436_s26, 4  ;;  %s2352_s0 = scalar_lea.vmem %s2351_s23, 128  ;;  %s2958_s1 = int_to_ptr.vmem [resolvable:$true] %s1970_s1 }
 0x499   : > { %v1700_v4 = vadd.f32 %v2343_v5, %v2849_v18  ;;  %v2162_v19 = vpack.c.bf16 %v1699_v50, %v1695_v49  ;;  %v2075_v27 = vrot.slane %v1874_v16, 9  ;;  %v2077_v0 = vrot.slane %v1874_v16, 10  ;;  %s2346_s22 = scalar_lea.vmem %s2958_s1, 64  ;;  %p2353_p0 = scmp.lt.s32.totalorder %s2958_s1, %s2351_s23 }
 0x49a   : > { %v2152_v26 = vpack.c.bf16 %v1698_v56, %v1694_v21  ;;  %v1863_v18 = vmul.f32 %v2344_v6, %v2070_v57  ;;  %v1872_v22 = vmul.f32 %v2073_v10, %v1864_v7  ;;  %v3019_v46 = vlaneseq  ;;  %p2347_p11 = scmp.ne.s32.totalorder %s2958_s1, %s2346_s22  ;;  %p2354_p1 = scmp.lt.s32.totalorder %s2352_s0, %s2346_s22 }
 0x49b   : > { %v2160_v37 = vpack.c.bf16 %v1700_v4, %v1696_v9 }
 0x49c   : > { %2153 = vmatprep.subr.bf16.mxu0 %v2152_v26  ;;  %v1871_v62 = vmul.f32 %v2072_v45, %v1863_v18  ;;  %v1876_v25 = vmul.f32 %v1874_v16, %v1872_v22  ;;  %vm1952_vm1 = vcmp.lt.s32.totalorder %v3019_v46, 512  ;;  %p2348_p12 = pnand %p2347_p11, %p2527_p5  ;;  %p2355_p2 = por %p2354_p1, %p2353_p0 }
 0x49d   : > { %2161 = vmatprep.subr.bf16.mxu1 %v2160_v37  ;;  %2155 = vmatpush1.bf16.msra.mxu0 %v2154_v8 }
 0x49e   : > { %2163 = vmatpush1.bf16.msra.mxu1 %v2162_v19  ;;  %v1875_v23 = vmul.f32 %v1873_v20, %v1871_v62  ;;  %v1886_v31 = vmul.f32 %v2075_v27, %v1876_v25  ;;  %p2349_p13 = pneg %p2348_p12 }
 0x4a0   : > { %2068 = vmatmul.mubr.msk.f32.vlgmr.msra.gmra.mrb[32].mxu0 %vm768_vm0, %v1701_v58  ;;  %v1885_v28 = vmul.f32 %v2074_v24, %v1875_v23  ;;  %v1894_v3 = vmul.f32 %v2077_v0, %v1886_v31  ;;  %p2356_p3 = pnand %p2355_p2, %p2349_p13 }
 0x4a1   : > { %2069 = vmatmul.mubr.msk.f32.vlgmr.msra.gmra.mrb[32].mxu1 %vm768_vm0, %v1701_v58 }
 0x4a2   : > { %v1893_v1 = vmul.f32 %v2076_v29, %v1885_v28  ;;  %v1908_v60 = vrot.slane %v1894_v3, %v2628_v41  ;;  %v1912_v51 = vrot.slane %v1894_v3, %v2631_v42 }
 0x4a4   : > { %v1900_v55 = vrot.slane %v1893_v1, %v2628_v41  ;;  %v1904_v61 = vrot.slane %v1893_v1, %v2631_v42 }
 0x573   : > { %v1781_v59 = vpop.f32.mrb[32].mxu0 }
 0x574   : > { %v1782_v43 = vadd.f32 %v1781_v59, %v1711_v39  ;;  %v1852_v34 = vpop.f32.mrb[32].mxu1  ;;  %v1783_v48 = vpop.f32.mrb[33].mxu0 }
 0x575   : > { %v1853_v15 = vadd.f32 %v1852_v34, %v1711_v39  ;;  %v1784_v52 = vadd.f32 %v1783_v48, %v1711_v39  ;;  %v1854_v12 = vpop.f32.mrb[33].mxu1 }
 0x576   : > { %v1917_v32 = vmul.f32 %v1900_v55, %v1782_v43  ;;  %v1855_v13 = vadd.f32 %v1854_v12, %v1711_v39 }
 0x577   : > { %v1919_v53 = vmul.f32 %v1908_v60, %v1853_v15  ;;  %v1918_v63 = vmul.f32 %v1904_v61, %v1784_v52 }
 0x578   : > { %v1920_v41 = vmul.f32 %v1912_v51, %v1855_v13 }
 0x579   : > { %v1925_v35 = vcombine.low %v1917_v32, %v1918_v63 }
 0x57a   : > { %v1926_v30 = vcombine.low %v1919_v53, %v1920_v41 }
 0x57b   : > { %v1933_v47 = vrot.slane %v1925_v35, %v1932_v17 }
 0x57c   : > { %v1940_v44 = vrot.slane %v1926_v30, %v1932_v17 }
 0x57e   : > { %v1941_v42 = vcombine.low %v1933_v47, %v1940_v44 }
 0x580   : > { %v1948_v54 = vrot.slane %v1941_v42, %v1932_v17 }
 0x582   : > { %1954 = vst.msk [vmem:[%s436_s26] sm:$0xf] %vm1952_vm1, %v1948_v54 }
 0x583   : > { %2359 = shalt.err (!%p2356_p3)
}
 0x584   : > { %s2360_s25 = scalar_lea.hbm %s2956_s17, 64  ;;  %s2364_s14 = scalar_lea.hbm %s3011_s13, 128 }
 0x585   : > { %p2361_p4 = scmp.ne.s32.totalorder %s2956_s17, %s2360_s25  ;;  %p2365_p9 = scmp.lt.u32.totalorder %s2956_s17, %s3011_s13 }
 0x586   : > { %p2366_p10 = scmp.lt.u32.totalorder %s2364_s14, %s2360_s25  ;;  %p2368_p12 = scmp.lt.u32.totalorder %s2360_s25, %s2956_s17 }
 0x587   : > { %p2362_p7 = pnand %p2361_p4, %p2527_p5 }
 0x588   : > { %p2367_p11 = por %p2366_p10, %p2365_p9 }
 0x589   : > { %p2363_p8 = pneg %p2362_p7 }
 0x58a   : > { %p2369_p13 = por %p2368_p12, %p2367_p11 }
 0x58c   : > { %p2370_p0 = pnand %p2369_p13, %p2363_p8 }
 0x58e   : > { %2373 = shalt.err (!%p2370_p0)
}
 0x58f   : > { %2164 = dma.vmem_to_hbm [thread:$0]  (%p2527_p5), %s2958_s1, 64, %s2956_s17, %s1956_s21  }
 0x590 PF: > { %p2170_p1 = scmp.ge.s32.totalorder %s2408_s30, 2  ;;  %s1982_s0 = sand.u32 1, %s2396_s27  }
 0x591   : > { %s1983_s22 = scalar_lea.sflag [#allocation4], %s1982_s0 }
 0x592   : > { %p2167_p2 = pnand %p2170_p1, %p2531_p6 }
 0x594   : > { %2391 = dma.done.wait (!%p2167_p2), %s1983_s22, 64  }
 0x595   : > { %2393 = vsyncadd (!%p2167_p2), %s1983_s22, 4294967232  ;;  %p25_p3 = scmp.ge.s32.totalorder %s2514_s15, 4   ;;  %s3020_s27 = smov %s2400_s28 }
 0x596   : > { %s3021_s28 = smov %s2404_s29  ;;  %s3022_s29 = smov %s2525_s18 }
 0x597   : > { %s3023_s30 = smov %s2514_s15  ;;  %27 = sbr.rel (!%p25_p3) target bundleno = 6 (0x6), region = 107 }
 0x59e   :  { %1988 = vsyncpa [#allocation4], 1 }
 0x59f   :  { %1990 = vsyncpa [#allocation4 + $0x1], 1 }

</bundles_post_ra>
